<compile_context>
chip_gen: v7x
topology: tpu7x:2x2x1
jax: 0.10.0
libtpu: 0.0.40
codegen_flags: <defaults>
</compile_context>

<pallas_src>
import jax
import jax.numpy as jnp
from jax.experimental import pallas as pl
from jax.experimental.pallas import tpu as pltpu


def _fitter_kernel(x_ref, w1_ref, b1_ref, ws_ref, bs_ref, wl_ref, bl_ref, o_ref):
    # x_ref : (2, TM)        transposed, normalization folded into w1/b1
    # w1_ref: (H, 2)         folded fc1 weight (torch layout, scaled)
    # b1_ref: (H, 1)         folded fc1 bias (column)
    # ws_ref: (L, H, H)      hidden weights, torch layout (out, in)
    # bs_ref: (L, H, 1)      hidden biases (columns)
    # wl_ref: (H, 1)         fcLast weight (column)
    # bl_ref: (1, 1) SMEM    fcLast bias (scalar)
    # o_ref : (1, TM)        lane-dense output row

    # First layer (in_features = 2): VPU broadcast multiply-adds, no MXU pass.
    h = jnp.tanh(
        w1_ref[:, 0:1] * x_ref[0:1, :]
        + w1_ref[:, 1:2] * x_ref[1:2, :]
        + b1_ref[...]
    )                                                     # (H, TM)

    # Hidden layers (H x H): MXU, statically unrolled over the small layer count.
    for l in range(ws_ref.shape[0]):
        h = jnp.tanh(
            jnp.dot(ws_ref[l], h, preferred_element_type=jnp.float32)
            + bs_ref[l]
        )                                                 # (H, TM)

    # Last layer (H -> 1): VPU multiply + sublane reduction; result is already
    # a lane-dense (1, TM) row -- no relayout, unmasked store.
    o_ref[...] = jnp.sum(h * wl_ref[...], axis=0, keepdims=True) + bl_ref[0, 0]


def fitter_forward(x, lbub, w1, b1, ws, bs, wl, bl, *, tile_m=None):
    N = x.shape[0]
    H = w1.shape[1]
    L = ws.shape[0]

    if tile_m is None:
        n128 = 128 * pl.cdiv(N, 128)
        cap = 8 * 1024                          # per-tile row cap: VMEM stays flat on v7x at large N
        if n128 <= cap:
            tile_m = n128                       # one tile: no per-grid-step overhead on 1-TC v5e/v6e
        else:
            ntiles = 2 * pl.cdiv(n128, 2 * cap)  # even tile count -> even split over v7x's 2 TCs
            tile_m = 128 * pl.cdiv(n128, 128 * ntiles)
    assert tile_m % 128 == 0, "tile_m must be a multiple of 128 (lane-dense output)"

    pad = (-N) % tile_m
    n_pad = N + pad
    grid = (n_pad // tile_m,)

    # Transpose to batch-on-lanes layout: (2, n_pad).
    xt = (jnp.pad(x, ((0, pad), (0, 0))) if pad else x).T

    # Fold 2*(x - lb)/(ub - lb) - 1 into the first layer (pure constant folding
    # on the weights; removes the per-tile normalization and the lb/ub operand).
    lb, ub = lbub[0], lbub[1]
    scale = 2.0 / (ub - lb)                               # (2,)
    shift = -2.0 * lb / (ub - lb) - 1.0                   # (2,)
    w1_eff_t = (w1 * scale[:, None]).T                    # (H, 2)
    b1_eff_col = (b1 + shift @ w1).T                      # (H, 1)
    ws_t = jnp.swapaxes(ws, 1, 2)                         # (L, H, H) torch (out, in) layout
    bs_col = jnp.swapaxes(bs, 1, 2)                       # (L, H, 1)
    wl_col = wl                                           # (H, 1)

    full = lambda shape: pl.BlockSpec(shape, lambda i: tuple(0 for _ in shape))

    flops = 2 * n_pad * (2 * H + L * H * H + H)
    transcendentals = n_pad * H * (L + 1)
    bytes_accessed = 4 * (3 * n_pad + 3 * H + L * H * (H + 1) + H + 1)

    out = pl.pallas_call(
        _fitter_kernel,
        out_shape=jax.ShapeDtypeStruct((1, n_pad), jnp.float32),
        grid_spec=pltpu.PrefetchScalarGridSpec(
            num_scalar_prefetch=0,
            grid=grid,
            in_specs=[
                pl.BlockSpec((2, tile_m), lambda i: (0, i)),            # x^T tile (lanes = batch)
                full((H, 2)),                                           # folded fc1 weight
                full((H, 1)),                                           # folded fc1 bias
                full((L, H, H)),                                        # hidden weights (transposed)
                full((L, H, 1)),                                        # hidden biases
                full((H, 1)),                                           # fcLast weight column
                pl.BlockSpec(memory_space=pltpu.MemorySpace.SMEM),      # fcLast bias scalar
            ],
            out_specs=pl.BlockSpec((1, tile_m), lambda i: (0, i)),
        ),
        compiler_params=pltpu.CompilerParams(
            dimension_semantics=("parallel",),
        ),
        cost_estimate=pl.CostEstimate(
            flops=flops, transcendentals=transcendentals, bytes_accessed=bytes_accessed),
    )(xt, w1_eff_t, b1_eff_col, ws_t, bs_col, wl_col, bl)

    return out.reshape(n_pad, 1)[:N]                      # (N, 1)


def _xavier_uniform(key, shape, gain):
    # shape = (fan_in, fan_out); matches torch.nn.init.xavier_uniform_ on weight.T
    fan_in, fan_out = shape
    bound = gain * jnp.sqrt(6.0 / (fan_in + fan_out))
    return jax.random.uniform(key, shape, jnp.float32, -bound, bound)


def _default_bias(key, fan_in, shape):
    # PyTorch nn.Linear default bias init: U(-1/sqrt(fan_in), 1/sqrt(fan_in)).
    bound = 1.0 / (fan_in ** 0.5)
    return jax.random.uniform(key, shape, jnp.float32, -bound, bound)


def init_params(key, num_hidden_nodes, num_hidden_layers):
    gain = 5.0 / 3.0  # torch.nn.init.calculate_gain('tanh')
    H, L = num_hidden_nodes, num_hidden_layers
    keys = jax.random.split(key, 2 * (L + 2))

    w1 = _xavier_uniform(keys[0], (2, H), gain)                   # fc1.weight.T
    b1 = _default_bias(keys[1], 2, (1, H))                        # fc1.bias
    ws = jnp.stack([_xavier_uniform(keys[2 + 2 * l], (H, H), gain)
                    for l in range(L)])                           # (L, H, H) (fan_in, fan_out)
    bs = jnp.stack([_default_bias(keys[3 + 2 * l], H, (1, H))
                    for l in range(L)])                           # (L, 1, H)
    wl = _xavier_uniform(keys[2 + 2 * L], (H, 1), gain)           # fcLast.weight.T
    bl = _default_bias(keys[3 + 2 * L], H, (1, 1))                # fcLast.bias
    return w1, b1, ws, bs, wl, bl


def fitter_reference(x, lbub, w1, b1, ws, bs, wl, bl):
    lb, ub = lbub[0], lbub[1]
    h = 2.0 * (x - lb) / (ub - lb) - 1.0
    h = jnp.tanh(h @ w1 + b1)
    for l in range(ws.shape[0]):
        h = jnp.tanh(h @ ws[l] + bs[l])
    return h @ wl + bl


if __name__ == "__main__":
    key = jax.random.PRNGKey(0)
    k_x, k_p = jax.random.split(key)

    num_hidden_nodes = 32
    num_hidden_layers = 3
    N = 256  # number of (x, t) collocation points

    # Burgers' domain: x in [-1, 1], t in [0, 1]  ->  lb / ub as in XT.min/max
    lbub = jnp.array([[-1.0, 0.0],
                      [ 1.0, 1.0]], dtype=jnp.float32)

    kx, kt = jax.random.split(k_x)
    xs = jax.random.uniform(kx, (N, 1), jnp.float32, -1.0, 1.0)
    ts = jax.random.uniform(kt, (N, 1), jnp.float32, 0.0, 1.0)
    x = jnp.concatenate([xs, ts], axis=1)                  # (N, 2)

    params = init_params(k_p, num_hidden_nodes, num_hidden_layers)

    # Jit the wrapper so the host-side constant folding (w1/b1) and the
    # transpose/pad fuse with the pallas_call instead of running as tiny
    # standalone XLA ops every step.
    fitter_fwd = jax.jit(fitter_forward)

    out = fitter_fwd(x, lbub, *params)
    out = jax.block_until_ready(out)

    ref = fitter_reference(x, lbub, *params)
    assert out.shape == (N, 1), out.shape
    assert jnp.allclose(out, ref, atol=1e-5, rtol=1e-5), (
        float(jnp.max(jnp.abs(out - ref))))

    print("KERNEL_OK")
</pallas_src>

<mosaic_0001>
module attributes {stable_mosaic.version = 11 : i64} {
  func.func @_fitter_kernel(%arg0: i32, %arg1: memref<2x256xf32, #tpu.memory_space<vmem>>, %arg2: memref<32x2xf32, #tpu.memory_space<vmem>>, %arg3: memref<32x1xf32, #tpu.memory_space<vmem>>, %arg4: memref<3x32x32xf32, #tpu.memory_space<vmem>>, %arg5: memref<3x32x1xf32, #tpu.memory_space<vmem>>, %arg6: memref<32x1xf32, #tpu.memory_space<vmem>>, %arg7: memref<1x1xf32, #tpu.memory_space<smem>>, %arg8: memref<1x256xf32, #tpu.memory_space<vmem>>) attributes {dimension_semantics = [#tpu.dimension_semantics<parallel>], iteration_bounds = array<i64: 1>, scalar_prefetch = 0 : i64, scratch_operands = 0 : i64, tpu.core_type = #tpu.core_type<tc>, window_params = [{transform_indices = @transform_0, window_bounds = array<i64: 2, 256>}, {pipeline_mode = #tpu.pipeline_mode<synchronous>, transform_indices = @transform_1, window_bounds = array<i64: 32, 2>}, {pipeline_mode = #tpu.pipeline_mode<synchronous>, transform_indices = @transform_2, window_bounds = array<i64: 32, 1>}, {pipeline_mode = #tpu.pipeline_mode<synchronous>, transform_indices = @transform_3, window_bounds = array<i64: 3, 32, 32>}, {pipeline_mode = #tpu.pipeline_mode<synchronous>, transform_indices = @transform_4, window_bounds = array<i64: 3, 32, 1>}, {pipeline_mode = #tpu.pipeline_mode<synchronous>, transform_indices = @transform_5, window_bounds = array<i64: 32, 1>}, {transform_indices = @transform_6, window_bounds = array<i64: 1, 1>}, {transform_indices = @transform_7, window_bounds = array<i64: 1, 256>}]} {
    %c0 = arith.constant 0 : index
    %c0_0 = arith.constant 0 : index
    %0 = vector.load %arg2[%c0, %c0_0] : memref<32x2xf32, #tpu.memory_space<vmem>>, vector<32x1xf32>
    %c0_1 = arith.constant 0 : index
    %c0_2 = arith.constant 0 : index
    %1 = vector.load %arg1[%c0_1, %c0_2] : memref<2x256xf32, #tpu.memory_space<vmem>>, vector<1x256xf32>
    %2 = vector.broadcast %0 : vector<32x1xf32> to vector<32x256xf32>
    %3 = vector.broadcast %1 : vector<1x256xf32> to vector<32x256xf32>
    %4 = arith.mulf %2, %3 : vector<32x256xf32>
    %c0_3 = arith.constant 0 : index
    %c1 = arith.constant 1 : index
    %5 = vector.load %arg2[%c0_3, %c1] : memref<32x2xf32, #tpu.memory_space<vmem>>, vector<32x1xf32>
    %c1_4 = arith.constant 1 : index
    %c0_5 = arith.constant 0 : index
    %6 = vector.load %arg1[%c1_4, %c0_5] : memref<2x256xf32, #tpu.memory_space<vmem>>, vector<1x256xf32>
    %7 = vector.broadcast %5 : vector<32x1xf32> to vector<32x256xf32>
    %8 = vector.broadcast %6 : vector<1x256xf32> to vector<32x256xf32>
    %9 = arith.mulf %7, %8 : vector<32x256xf32>
    %10 = arith.addf %4, %9 : vector<32x256xf32>
    %c0_6 = arith.constant 0 : index
    %c0_7 = arith.constant 0 : index
    %11 = vector.load %arg3[%c0_6, %c0_7] : memref<32x1xf32, #tpu.memory_space<vmem>>, vector<32x1xf32>
    %12 = vector.broadcast %11 : vector<32x1xf32> to vector<32x256xf32>
    %13 = arith.addf %10, %12 : vector<32x256xf32>
    %14 = math.tanh %13 : vector<32x256xf32>
    %c0_8 = arith.constant 0 : index
    %c0_9 = arith.constant 0 : index
    %c0_10 = arith.constant 0 : index
    %15 = vector.load %arg4[%c0_8, %c0_9, %c0_10] : memref<3x32x32xf32, #tpu.memory_space<vmem>>, vector<1x32x32xf32>
    %16 = vector.shape_cast %15 : vector<1x32x32xf32> to vector<32x32xf32>
    %cst = arith.constant dense<0.000000e+00> : vector<32x256xf32>
    %17 = tpu.matmul %16, %14, %cst {dimension_numbers = #tpu.dot_dimension_numbers<[1], [0], [0], [1], [0, 0, 1, 1], [], []>} : vector<32x32xf32>, vector<32x256xf32>, vector<32x256xf32> -> vector<32x256xf32>
    %c0_11 = arith.constant 0 : index
    %c0_12 = arith.constant 0 : index
    %c0_13 = arith.constant 0 : index
    %18 = vector.load %arg5[%c0_11, %c0_12, %c0_13] : memref<3x32x1xf32, #tpu.memory_space<vmem>>, vector<1x32x1xf32>
    %19 = vector.shape_cast %18 : vector<1x32x1xf32> to vector<32x1xf32>
    %20 = vector.broadcast %19 : vector<32x1xf32> to vector<32x256xf32>
    %21 = arith.addf %17, %20 : vector<32x256xf32>
    %22 = math.tanh %21 : vector<32x256xf32>
    %c1_14 = arith.constant 1 : index
    %c0_15 = arith.constant 0 : index
    %c0_16 = arith.constant 0 : index
    %23 = vector.load %arg4[%c1_14, %c0_15, %c0_16] : memref<3x32x32xf32, #tpu.memory_space<vmem>>, vector<1x32x32xf32>
    %24 = vector.shape_cast %23 : vector<1x32x32xf32> to vector<32x32xf32>
    %cst_17 = arith.constant dense<0.000000e+00> : vector<32x256xf32>
    %25 = tpu.matmul %24, %22, %cst_17 {dimension_numbers = #tpu.dot_dimension_numbers<[1], [0], [0], [1], [0, 0, 1, 1], [], []>} : vector<32x32xf32>, vector<32x256xf32>, vector<32x256xf32> -> vector<32x256xf32>
    %c1_18 = arith.constant 1 : index
    %c0_19 = arith.constant 0 : index
    %c0_20 = arith.constant 0 : index
    %26 = vector.load %arg5[%c1_18, %c0_19, %c0_20] : memref<3x32x1xf32, #tpu.memory_space<vmem>>, vector<1x32x1xf32>
    %27 = vector.shape_cast %26 : vector<1x32x1xf32> to vector<32x1xf32>
    %28 = vector.broadcast %27 : vector<32x1xf32> to vector<32x256xf32>
    %29 = arith.addf %25, %28 : vector<32x256xf32>
    %30 = math.tanh %29 : vector<32x256xf32>
    %c2 = arith.constant 2 : index
    %c0_21 = arith.constant 0 : index
    %c0_22 = arith.constant 0 : index
    %31 = vector.load %arg4[%c2, %c0_21, %c0_22] : memref<3x32x32xf32, #tpu.memory_space<vmem>>, vector<1x32x32xf32>
    %32 = vector.shape_cast %31 : vector<1x32x32xf32> to vector<32x32xf32>
    %cst_23 = arith.constant dense<0.000000e+00> : vector<32x256xf32>
    %33 = tpu.matmul %32, %30, %cst_23 {dimension_numbers = #tpu.dot_dimension_numbers<[1], [0], [0], [1], [0, 0, 1, 1], [], []>} : vector<32x32xf32>, vector<32x256xf32>, vector<32x256xf32> -> vector<32x256xf32>
    %c2_24 = arith.constant 2 : index
    %c0_25 = arith.constant 0 : index
    %c0_26 = arith.constant 0 : index
    %34 = vector.load %arg5[%c2_24, %c0_25, %c0_26] : memref<3x32x1xf32, #tpu.memory_space<vmem>>, vector<1x32x1xf32>
    %35 = vector.shape_cast %34 : vector<1x32x1xf32> to vector<32x1xf32>
    %36 = vector.broadcast %35 : vector<32x1xf32> to vector<32x256xf32>
    %37 = arith.addf %33, %36 : vector<32x256xf32>
    %38 = math.tanh %37 : vector<32x256xf32>
    %c0_27 = arith.constant 0 : index
    %c0_28 = arith.constant 0 : index
    %39 = vector.load %arg6[%c0_27, %c0_28] : memref<32x1xf32, #tpu.memory_space<vmem>>, vector<32x1xf32>
    %40 = vector.broadcast %39 : vector<32x1xf32> to vector<32x256xf32>
    %41 = arith.mulf %38, %40 : vector<32x256xf32>
    %cst_29 = arith.constant dense<0.000000e+00> : vector<256xf32>
    %42 = vector.multi_reduction <add>, %41, %cst_29 [0] : vector<32x256xf32> to vector<256xf32>
    %43 = vector.shape_cast %42 : vector<256xf32> to vector<1x256xf32>
    %c0_30 = arith.constant 0 : index
    %c0_31 = arith.constant 0 : index
    %44 = memref.load %arg7[%c0_30, %c0_31] : memref<1x1xf32, #tpu.memory_space<smem>>
    %45 = vector.broadcast %44 : f32 to vector<1x256xf32>
    %46 = arith.addf %43, %45 : vector<1x256xf32>
    %c0_32 = arith.constant 0 : index
    %c0_33 = arith.constant 0 : index
    %47 = vector.load %arg8[%c0_32, %c0_33] : memref<1x256xf32, #tpu.memory_space<vmem>>, vector<1x256xf32>
    tpu.vector_store %arg8[%c0_32, %c0_33], %46 {strides = array<i32>} : memref<1x256xf32, #tpu.memory_space<vmem>>, vector<1x256xf32>,
    return
  }
  func.func @transform_0(%arg0: i32) -> (i32, i32) {
    %c0_i32 = arith.constant 0 : i32
    %c0_i32_0 = arith.constant 0 : i32
    return %c0_i32, %arg0 : i32, i32
  }
  func.func @transform_1(%arg0: i32) -> (i32, i32) {
    %c0_i32 = arith.constant 0 : i32
    %c0_i32_0 = arith.constant 0 : i32
    %c0_i32_1 = arith.constant 0 : i32
    return %c0_i32, %c0_i32_0 : i32, i32
  }
  func.func @transform_2(%arg0: i32) -> (i32, i32) {
    %c0_i32 = arith.constant 0 : i32
    %c0_i32_0 = arith.constant 0 : i32
    %c0_i32_1 = arith.constant 0 : i32
    return %c0_i32, %c0_i32_0 : i32, i32
  }
  func.func @transform_3(%arg0: i32) -> (i32, i32, i32) {
    %c0_i32 = arith.constant 0 : i32
    %c0_i32_0 = arith.constant 0 : i32
    %c0_i32_1 = arith.constant 0 : i32
    %c0_i32_2 = arith.constant 0 : i32
    return %c0_i32, %c0_i32_0, %c0_i32_1 : i32, i32, i32
  }
  func.func @transform_4(%arg0: i32) -> (i32, i32, i32) {
    %c0_i32 = arith.constant 0 : i32
    %c0_i32_0 = arith.constant 0 : i32
    %c0_i32_1 = arith.constant 0 : i32
    %c0_i32_2 = arith.constant 0 : i32
    return %c0_i32, %c0_i32_0, %c0_i32_1 : i32, i32, i32
  }
  func.func @transform_5(%arg0: i32) -> (i32, i32) {
    %c0_i32 = arith.constant 0 : i32
    %c0_i32_0 = arith.constant 0 : i32
    %c0_i32_1 = arith.constant 0 : i32
    return %c0_i32, %c0_i32_0 : i32, i32
  }
  func.func @transform_6(%arg0: i32) -> (i32, i32) {
    %c0_i32 = arith.constant 0 : i32
    %c0_i32_0 = arith.constant 0 : i32
    %c0_i32_1 = arith.constant 0 : i32
    return %c0_i32, %c0_i32_0 : i32, i32
  }
  func.func @transform_7(%arg0: i32) -> (i32, i32) {
    %c0_i32 = arith.constant 0 : i32
    %c0_i32_0 = arith.constant 0 : i32
    return %c0_i32, %arg0 : i32, i32
  }
}

</mosaic_0001>

<bundles_post_ra>
// kernel: fitter_forward.1
= control target key start
LH: loop header
LB: loop body
LE: loop exit
PB: predicated region body
PF: predicated region fallthrough
CT: control target
= control target key end

     0   :  { %v820_v2 = vmov 1   ;;  %v821_v4 = vmov 0   ;;  %s1025_s0 = inlined_call_operand.vmem [shape: f32[2,256], index: 0, kind: input, shape index: {}]   ;;  %s1026_s1 = inlined_call_operand.vmem [shape: f32[32,2], index: 1, kind: input, shape index: {}]   ;;  %s1027_s2 = inlined_call_operand.vmem [shape: f32[32,1], index: 2, kind: input, shape index: {}]   ;;  %s1028_s3 = inlined_call_operand.vmem [shape: f32[3,32,32], index: 3, kind: input, shape index: {}]   ;;  %s1029_s4 = inlined_call_operand.vmem [shape: f32[3,32,1], index: 4, kind: input, shape index: {}]   ;;  %s1030_s5 = inlined_call_operand.vmem [shape: f32[32,1], index: 5, kind: input, shape index: {}]   ;;  %s1031_s6 = inlined_call_operand.<no memory space> [shape: f32[1,1], index: 6, kind: input, shape index: {}]   ;;  %s1032_s7 = inlined_call_operand.hbm [shape: f32[1,256], index: 7, kind: output, shape index: {}]  }
   0x1   :  { %v30_v0 = vld [vmem:[%s1026_s1 + $0x10] sm:$0xff]  ;;  %v28_v1 = vld [vmem:[%s1026_s1] sm:$0xff]  ;;  %728 = vset.pattern.permute.xlu0 %v820_v2  ;;  %726 = vset.pattern.permute.xlu1 %v820_v2  ;;  %v29_v3 = vld [vmem:[%s1026_s1 + $0x8] sm:$0xff] }
   0x2   :  { %83 = vperm.xlu0 %728, %v30_v0   ;;  %75 = vperm.xlu1 %726, %v28_v1   ;;  %v31_v5 = vld [vmem:[%s1026_s1 + $0x18] sm:$0xff] }
   0x6   :  { %729 = vset.pattern.permute.xlu0 %v821_v4  ;;  %79 = vperm.xlu1 %726, %v29_v3  }
   0x7   :  { %35 = vperm.xlu0 %729, %v28_v1  }
   0x8   :  { %13 = vsyncpa [#allocation4], 0  ;;  %v118_v6 = vld [vmem:[%s1027_s2 + $0x8] sm:$0xff]  ;;  %v117_v7 = vld [vmem:[%s1027_s2] sm:$0xff]  ;;  %v822_v22 = vmov 0.0   ;;  %v54_v27 = vlaneseq  ;;  %vm185_vm0 = vcmask 261120  }
   0x9   :  { %v161_v8 = vld [vmem:[%s1029_s4] sm:$0xff]  ;;  %v119_v9 = vld [vmem:[%s1027_s2 + $0x10] sm:$0xff]  ;;  %v120_v11 = vld [vmem:[%s1027_s2 + $0x18] sm:$0xff]  ;;  %262 = vmatprep.mubr.f32.mxu0 %v822_v22  ;;  %274 = vmatprep.mubr.f32.mxu1 %v822_v22  ;;  %s824_s23 = smov [#allocation3]  }
   0xa   :  { %727 = vset.pattern.permute.xlu1 %v821_v4  ;;  %v163_v10 = vld [vmem:[%s1029_s4 + $0x10] sm:$0xff]  ;;  %v673_v12 = vld [vmem:[%s1029_s4 + $0x20] sm:$0xff]  ;;  %v162_v13 = vld [vmem:[%s1029_s4 + $0x8] sm:$0xff]  ;;  %v940_v30 = vshrl.u32 %v54_v27, 7  ;;  %s656_s24 = sshll.u32 %s824_s23, 4  ;;  %vm647_vm1 = vcmp.lt.s32.totalorder %v54_v27, 256  ;;  %s657_s24 = int_to_ptr.vmem [resolvable:$true] %s656_s24 }
   0xb   :  { %40 = vperm.xlu0 %729, %v29_v3   ;;  %50 = vperm.xlu1 %727, %v31_v5   ;;  %v675_v14 = vld [vmem:[%s1029_s4 + $0x30] sm:$0xff]  ;;  %v164_v15 = vld [vmem:[%s1029_s4 + $0x18] sm:$0xff]  ;;  %v685_v16 = vld [vmem:[%s1029_s4 + $0x40] sm:$0xff]  ;;  %s796_s25 = scalar_lea.vmem %s657_s24, 32  ;;  %p801_p1 = scmp.lt.s32.totalorder %s657_s24, %s657_s24 }
   0xc   :  { %v674_v17 = vld [vmem:[%s1029_s4 + $0x28] sm:$0xff]  ;;  %v687_v18 = vld [vmem:[%s1029_s4 + $0x50] sm:$0xff]  ;;  %v676_v19 = vld [vmem:[%s1029_s4 + $0x38] sm:$0xff]  ;;  %v56_v34 = vsub.s32 0, %v940_v30  ;;  %v60_v35 = vsub.s32 1, %v940_v30  ;;  %p797_p0 = scmp.ne.s32.totalorder %s657_s24, %s796_s25  ;;  %p802_p2 = scmp.lt.s32.totalorder %s796_s25, %s796_s25 }
   0xd   :  { %v573_v20 = vld [vmem:[%s1030_s5] sm:$0xff]  ;;  %v686_v21 = vld [vmem:[%s1029_s4 + $0x48] sm:$0xff]  ;;  %v575_v23 = vld [vmem:[%s1030_s5 + $0x10] sm:$0xff] }
   0xe   :  { %v688_v24 = vld [vmem:[%s1029_s4 + $0x58] sm:$0xff]  ;;  %v574_v25 = vld [vmem:[%s1030_s5 + $0x8] sm:$0xff]  ;;  %v32_v33 = vld [vmem:[%s1025_s0] ss:$2 sm:$0x3]  ;;  %p803_p3 = por %p802_p2, %p801_p1 }
   0xf   :  { %45 = vperm.xlu0 %729, %v30_v0   ;;  %730 = vset.pattern.permute.xlu1 %v820_v2  ;;  %v576_v26 = vld [vmem:[%s1030_s5 + $0x18] sm:$0xff]  ;;  %v664_v36 = vld [vmem:[%s1025_s0 + $0x1] ss:$2 sm:$0x3]  ;;  %v57_v37 = vrot.slane %v32_v33, %v56_v34  ;;  %v61_v40 = vrot.slane %v32_v33, %v60_v35  ;;  %v159_v33 = vld [vmem:[%s1028_s3 + $0x10] sm:$0xff] }
  0x10   :  { %87 = vperm.xlu1 %730, %v31_v5   ;;  %v94_v41 = vrot.slane %v664_v36, %v56_v34  ;;  %v98_v42 = vrot.slane %v664_v36, %v60_v35  ;;  %v158_v34 = vld [vmem:[%s1028_s3 + $0x8] sm:$0xff]  ;;  %v160_v35 = vld [vmem:[%s1028_s3 + $0x18] sm:$0xff]  ;;  %p804_p4 = pnand %p803_p3, %p797_p0 }
  0x13   :  { %128 = vperm.xlu0 %729, %v118_v6  }
  0x14   :  { %731 = vset.pattern.permute.xlu1 %v821_v4 }
  0x15   :  { %123 = vperm.xlu1 %731, %v117_v7  }
  0x17   :  { %167 = vperm.xlu0 %729, %v161_v8  }
  0x19   :  { %133 = vperm.xlu1 %731, %v119_v9  }
  0x1b   :  { %177 = vperm.xlu0 %729, %v163_v10  }
  0x1d   :  { %138 = vperm.xlu1 %731, %v120_v11  }
  0x1f   :  { %307 = vperm.xlu0 %729, %v673_v12  }
  0x21   :  { %172 = vperm.xlu1 %731, %v162_v13  }
  0x23   :  { %317 = vperm.xlu0 %729, %v675_v14  }
  0x25   :  { %182 = vperm.xlu1 %731, %v164_v15  }
  0x27   :  { %446 = vperm.xlu0 %729, %v685_v16  }
  0x29   :  { %312 = vperm.xlu1 %731, %v674_v17  }
  0x2b   :  { %456 = vperm.xlu0 %729, %v687_v18  }
  0x2d   :  { %322 = vperm.xlu1 %731, %v676_v19  }
  0x2f   :  { %579 = vperm.xlu0 %729, %v573_v20  }
  0x31   :  { %451 = vperm.xlu1 %731, %v686_v21  }
  0x33   :  { %589 = vperm.xlu0 %729, %v575_v23  }
  0x35   :  { %461 = vperm.xlu1 %731, %v688_v24  }
  0x39   :  { %584 = vperm.xlu1 %731, %v574_v25  }
  0x3d   :  { %594 = vperm.xlu1 %731, %v576_v26  }
  0x81   :  { %v76_v28 = vpop.permute.xlu1 %75  ;;  %v84_v29 = vpop.permute.xlu0 %83 }
  0x82   :  { %v101_v51 = vmul.f32 %v94_v41, %v76_v28  ;;  %v102_v52 = vmul.f32 %v98_v42, %v76_v28  ;;  %v105_v63 = vmul.f32 %v94_v41, %v84_v29  ;;  %v106_v2 = vmul.f32 %v98_v42, %v84_v29 }
  0x85   :  { %v80_v31 = vpop.permute.xlu1 %79 }
  0x86   :  { %v36_v32 = vpop.permute.xlu0 %35  ;;  %v103_v47 = vmul.f32 %v94_v41, %v80_v31  ;;  %v104_v48 = vmul.f32 %v98_v42, %v80_v31 }
  0x87   :  { %v64_v45 = vmul.f32 %v57_v37, %v36_v32  ;;  %v65_v49 = vmul.f32 %v61_v40, %v36_v32  ;;  %v157_v32 = vld [vmem:[%s1028_s3] sm:$0xff] }
  0x89   :  { %v109_v56 = vadd.f32 %v101_v51, %v64_v45  ;;  %v110_v60 = vadd.f32 %v102_v52, %v65_v49 }
  0x8a   :  { %v41_v38 = vpop.permute.xlu0 %40  ;;  %v51_v39 = vpop.permute.xlu1 %50 }
  0x8b   :  { %v66_v43 = vmul.f32 %v57_v37, %v41_v38  ;;  %v67_v44 = vmul.f32 %v61_v40, %v41_v38  ;;  %v70_v8 = vmul.f32 %v57_v37, %v51_v39  ;;  %v71_v9 = vmul.f32 %v61_v40, %v51_v39 }
  0x8d   :  { %v111_v53 = vadd.f32 %v103_v47, %v66_v43  ;;  %v112_v54 = vadd.f32 %v104_v48, %v67_v44 }
  0x8e   :  { %v46_v46 = vpop.permute.xlu0 %45 }
  0x8f   :  { %v88_v50 = vpop.permute.xlu1 %87  ;;  %v68_v57 = vmul.f32 %v57_v37, %v46_v46  ;;  %v69_v61 = vmul.f32 %v61_v40, %v46_v46 }
  0x90   :  { %v107_v3 = vmul.f32 %v94_v41, %v88_v50  ;;  %v108_v4 = vmul.f32 %v98_v42, %v88_v50 }
  0x91   :  { %v113_v5 = vadd.f32 %v105_v63, %v68_v57  ;;  %v114_v6 = vadd.f32 %v106_v2, %v69_v61 }
  0x92   :  { %v129_v55 = vpop.permute.xlu0 %128  ;;  %v115_v12 = vadd.f32 %v107_v3, %v70_v8  ;;  %v116_v13 = vadd.f32 %v108_v4, %v71_v9  ;;  %v669_v4 = vld [vmem:[%s1028_s3 + $0x20] sm:$0xff] }
  0x93   :  { %v143_v58 = vadd.f32 %v129_v55, %v111_v53  ;;  %v144_v59 = vadd.f32 %v129_v55, %v112_v54 }
  0x94   :  { %v124_v62 = vpop.permute.xlu1 %123 }
  0x95   :  { %732 = vtanh.f32 %v143_v58  ;;  %v141_v0 = vadd.f32 %v124_v62, %v109_v56  ;;  %v142_v1 = vadd.f32 %v124_v62, %v110_v60 }
  0x96   :  { %734 = vtanh.f32 %v144_v59  ;;  %v168_v36 = vpop.permute.xlu0 %167 }
  0x97   :  { %736 = vtanh.f32 %v141_v0 }
  0x98   :  { %738 = vtanh.f32 %v142_v1  ;;  %v134_v7 = vpop.permute.xlu1 %133 }
  0x99   :  { %v145_v10 = vadd.f32 %v134_v7, %v113_v5  ;;  %v146_v11 = vadd.f32 %v134_v7, %v114_v6  ;;  %v670_v5 = vld [vmem:[%s1028_s3 + $0x28] sm:$0xff]  ;;  %v671_v6 = vld [vmem:[%s1028_s3 + $0x30] sm:$0xff]  ;;  %v672_v7 = vld [vmem:[%s1028_s3 + $0x38] sm:$0xff] }
  0x9a   :  { %v178_v38 = vpop.permute.xlu0 %177 }
  0x9b   :  { %740 = vtanh.f32 %v145_v10 }
  0x9c   :  { %v139_v14 = vpop.permute.xlu1 %138  ;;  %742 = vtanh.f32 %v146_v11 }
  0x9d   :  { %v147_v15 = vadd.f32 %v139_v14, %v115_v12  ;;  %v148_v16 = vadd.f32 %v139_v14, %v116_v13 }
  0x9e   :  { %v308_v8 = vpop.permute.xlu0 %307 }
  0x9f   :  { %v733_v17 = vpop.eup %732  ;;  %744 = vtanh.f32 %v147_v15 }
  0xa0   :  { %v735_v18 = vpop.eup %734  ;;  %746 = vtanh.f32 %v148_v16  ;;  %v173_v37 = vpop.permute.xlu1 %172 }
  0xa1   :  { %v737_v19 = vpop.eup %736 }
  0xa2   :  { %v739_v20 = vpop.eup %738  ;;  %v695_v21 = vpack.c.bf16 %v733_v17, %v737_v19 }
  0xa3   :  { %v693_v23 = vpack.c.bf16 %v735_v18, %v739_v20  ;;  %v318_v18 = vpop.permute.xlu0 %317 }
  0xa4   :  { %v183_v47 = vpop.permute.xlu1 %182 }
  0xa5   :  { %694 = vmatprep.subr.bf16.mxu0 %v693_v23  ;;  %717 = vmatprep.subr.bf16.mxu1 %v693_v23  ;;  %v741_v24 = vpop.eup %740 }
  0xa6   :  { %696 = vmatpush1.bf16.msra.mxu0 %v695_v21  ;;  %719 = vmatpush1.bf16.msra.mxu1 %v695_v21  ;;  %v743_v25 = vpop.eup %742 }
  0xa8   :  { %v313_v13 = vpop.permute.xlu1 %312 }
  0xa9   :  { %v745_v26 = vpop.eup %744 }
  0xaa   :  { %v747_v28 = vpop.eup %746  ;;  %v699_v29 = vpack.c.bf16 %v745_v26, %v741_v24 }
  0xab   :  { %v697_v31 = vpack.c.bf16 %v747_v28, %v743_v25 }
  0xac   :  { %v323_v24 = vpop.permute.xlu1 %322 }
  0xad   :  { %698 = vmatprep.subr.bf16.mxu0 %v697_v31  ;;  %718 = vmatprep.subr.bf16.mxu1 %v697_v31 }
  0xae   :  { %700 = vmatpush1.bf16.msra.mxu0 %v699_v29  ;;  %720 = vmatpush1.bf16.msra.mxu1 %v699_v29 }
  0xb1   :  { %665 = vmatmul.mubr.msk.f32.vlgmr.msra.gmra.mrb[0].mxu0 %vm185_vm0, %v157_v32  ;;  %667 = vmatmul.mubr.msk.f32.vlgmr.msra.gmra.mrb[0].mxu1 %vm185_vm0, %v159_v33 }
  0xb2   :  { %268 = vmatprep.mubr.f32.mxu0 %v822_v22  ;;  %280 = vmatprep.mubr.f32.mxu1 %v822_v22 }
  0xb5   :  { %666 = vmatmul.mubr.msk.f32.gmra.mrb[2].mxu0 %vm185_vm0, %v158_v34  ;;  %668 = vmatmul.mubr.msk.f32.gmra.mrb[2].mxu1 %vm185_vm0, %v160_v35 }
  0xb6   :  { %401 = vmatprep.mubr.f32.mxu1 %v822_v22  ;;  %540 = vmatprep.mubr.f32.mxu0 %v822_v22 }
 0x184   :  { %v264_v39 = vpop.f32.mrb[0].mxu0  ;;  %v276_v40 = vpop.f32.mrb[0].mxu1 }
 0x185   :  { %v265_v41 = vadd.f32 %v264_v39, %v168_v36  ;;  %v277_v42 = vadd.f32 %v276_v40, %v178_v38  ;;  %v266_v43 = vpop.f32.mrb[1].mxu0  ;;  %v278_v44 = vpop.f32.mrb[1].mxu1 }
 0x186   :  { %v267_v45 = vadd.f32 %v266_v43, %v168_v36  ;;  %v279_v46 = vadd.f32 %v278_v44, %v178_v38  ;;  %v681_v43 = vld [vmem:[%s1028_s3 + $0x40] sm:$0xff]  ;;  %v682_v44 = vld [vmem:[%s1028_s3 + $0x48] sm:$0xff] }
 0x187   :  { %748 = vtanh.f32 %v265_v41 }
 0x188   :  { %750 = vtanh.f32 %v277_v42  ;;  %v270_v48 = vpop.f32.mrb[2].mxu0  ;;  %v282_v49 = vpop.f32.mrb[2].mxu1 }
 0x189   :  { %752 = vtanh.f32 %v267_v45  ;;  %v271_v50 = vadd.f32 %v270_v48, %v173_v37  ;;  %v283_v51 = vadd.f32 %v282_v49, %v183_v47  ;;  %v272_v52 = vpop.f32.mrb[3].mxu0  ;;  %v284_v53 = vpop.f32.mrb[3].mxu1  ;;  %v683_v45 = vld [vmem:[%s1028_s3 + $0x50] sm:$0xff] }
 0x18a   :  { %754 = vtanh.f32 %v279_v46  ;;  %v273_v54 = vadd.f32 %v272_v52, %v173_v37  ;;  %v285_v55 = vadd.f32 %v284_v53, %v183_v47  ;;  %v684_v46 = vld [vmem:[%s1028_s3 + $0x58] sm:$0xff]  ;;  %v447_v47 = vpop.permute.xlu0 %446  ;;  %v452_v52 = vpop.permute.xlu1 %451 }
 0x18b   :  { %756 = vtanh.f32 %v271_v50 }
 0x18c   :  { %758 = vtanh.f32 %v283_v51 }
 0x18d   :  { %760 = vtanh.f32 %v273_v54 }
 0x18e   :  { %762 = vtanh.f32 %v285_v55 }
 0x191   :  { %v749_v56 = vpop.eup %748 }
 0x192   :  { %v751_v57 = vpop.eup %750 }
 0x193   :  { %v753_v58 = vpop.eup %752 }
 0x194   :  { %v755_v59 = vpop.eup %754 }
 0x195   :  { %v757_v60 = vpop.eup %756 }
 0x196   :  { %v759_v61 = vpop.eup %758  ;;  %v703_v62 = vpack.c.bf16 %v757_v60, %v749_v56 }
 0x197   :  { %v761_v63 = vpop.eup %760  ;;  %v707_v0 = vpack.c.bf16 %v759_v61, %v751_v57  ;;  %v462_v61 = vpop.permute.xlu1 %461 }
 0x198   :  { %v763_v1 = vpop.eup %762  ;;  %v701_v2 = vpack.c.bf16 %v761_v63, %v753_v58 }
 0x199   :  { %v705_v3 = vpack.c.bf16 %v763_v1, %v755_v59 }
 0x19a   :  { %702 = vmatprep.subr.bf16.mxu1 %v701_v2 }
 0x19b   :  { %704 = vmatpush1.bf16.msra.mxu1 %v703_v62 }
 0x19c   :  { %706 = vmatprep.subr.bf16.mxu1 %v705_v3 }
 0x19f   :  { %708 = vmatpush1.bf16.msra.mxu1 %v707_v0 }
 0x1a2   :  { %677 = vmatmul.mubr.msk.f32.vlgmr.msra.gmra.mrb[4].mxu1 %vm185_vm0, %v669_v4 }
 0x1a3   :  { %407 = vmatprep.mubr.f32.mxu1 %v822_v22 }
 0x1a6   :  { %678 = vmatmul.mubr.msk.f32.gmra.mrb[6].mxu1 %vm185_vm0, %v670_v5 }
 0x1a7   :  { %413 = vmatprep.mubr.f32.mxu1 %v822_v22 }
 0x1aa   :  { %679 = vmatmul.mubr.msk.f32.gmra.mrb[8].mxu1 %vm185_vm0, %v671_v6  ;;  %v585_v6 = vpop.permute.xlu1 %584 }
 0x1ab   :  { %419 = vmatprep.mubr.f32.mxu1 %v822_v22 }
 0x1ae   :  { %680 = vmatmul.mubr.msk.f32.gmra.mrb[10].mxu1 %vm185_vm0, %v672_v7 }
 0x275   :  { %v403_v9 = vpop.f32.mrb[4].mxu1 }
 0x276   :  { %v404_v10 = vadd.f32 %v403_v9, %v308_v8  ;;  %v405_v11 = vpop.f32.mrb[5].mxu1 }
 0x277   :  { %v406_v12 = vadd.f32 %v405_v11, %v308_v8 }
 0x278   :  { %764 = vtanh.f32 %v404_v10 }
 0x279   :  { %v409_v14 = vpop.f32.mrb[6].mxu1  ;;  %766 = vtanh.f32 %v406_v12 }
 0x27a   :  { %v410_v15 = vadd.f32 %v409_v14, %v313_v13  ;;  %v411_v16 = vpop.f32.mrb[7].mxu1 }
 0x27b   :  { %v412_v17 = vadd.f32 %v411_v16, %v313_v13 }
 0x27c   :  { %768 = vtanh.f32 %v410_v15 }
 0x27d   :  { %770 = vtanh.f32 %v412_v17  ;;  %v415_v19 = vpop.f32.mrb[8].mxu1 }
 0x27e   :  { %v416_v20 = vadd.f32 %v415_v19, %v318_v18  ;;  %v417_v21 = vpop.f32.mrb[9].mxu1 }
 0x27f   :  { %v418_v23 = vadd.f32 %v417_v21, %v318_v18  ;;  %v595_v21 = vpop.permute.xlu1 %594 }
 0x280   :  { %772 = vtanh.f32 %v416_v20 }
 0x281   :  { %v421_v25 = vpop.f32.mrb[10].mxu1  ;;  %774 = vtanh.f32 %v418_v23 }
 0x282   :  { %v422_v26 = vadd.f32 %v421_v25, %v323_v24  ;;  %v423_v28 = vpop.f32.mrb[11].mxu1  ;;  %v765_v31 = vpop.eup %764 }
 0x283   :  { %v424_v29 = vadd.f32 %v423_v28, %v323_v24  ;;  %v767_v32 = vpop.eup %766 }
 0x284   :  { %776 = vtanh.f32 %v422_v26 }
 0x285   :  { %778 = vtanh.f32 %v424_v29 }
 0x286   :  { %v769_v33 = vpop.eup %768 }
 0x287   :  { %v771_v34 = vpop.eup %770  ;;  %v711_v35 = vpack.c.bf16 %v769_v33, %v765_v31 }
 0x288   :  { %v709_v36 = vpack.c.bf16 %v771_v34, %v767_v32 }
 0x28a   :  { %710 = vmatprep.subr.bf16.mxu0 %v709_v36  ;;  %v773_v37 = vpop.eup %772 }
 0x28b   :  { %712 = vmatpush1.bf16.msra.mxu0 %v711_v35  ;;  %v775_v38 = vpop.eup %774 }
 0x28e   :  { %v777_v39 = vpop.eup %776 }
 0x28f   :  { %v779_v40 = vpop.eup %778  ;;  %v715_v41 = vpack.c.bf16 %v777_v39, %v773_v37  ;;  %v823_v37 = vmov 1966171168  }
 0x290   :  { %v713_v42 = vpack.c.bf16 %v779_v40, %v775_v38  ;;  %v631_v38 = vunpack.c.l.s4 %v823_v37 }
 0x292   :  { %714 = vmatprep.subr.bf16.mxu0 %v713_v42 }
 0x293   :  { %716 = vmatpush1.bf16.msra.mxu0 %v715_v41 }
 0x296   :  { %689 = vmatmul.mubr.msk.f32.vlgmr.msra.gmra.mrb[4].mxu0 %vm185_vm0, %v681_v43  ;;  %v624_v43 = vstv %s1031_s6 }
 0x297   :  { %546 = vmatprep.mubr.f32.mxu0 %v822_v22 }
 0x29a   :  { %690 = vmatmul.mubr.msk.f32.gmra.mrb[6].mxu0 %vm185_vm0, %v682_v44  ;;  %v632_v44 = vunpack.c.0.s8 %v631_v38 }
 0x29b   :  { %552 = vmatprep.mubr.f32.mxu0 %v822_v22 }
 0x29e   :  { %691 = vmatmul.mubr.msk.f32.gmra.mrb[8].mxu0 %vm185_vm0, %v683_v45 }
 0x29f   :  { %558 = vmatprep.mubr.f32.mxu0 %v822_v22  ;;  %v457_v22 = vpop.permute.xlu0 %456 }
 0x2a2   :  { %692 = vmatmul.mubr.msk.f32.gmra.mrb[10].mxu0 %vm185_vm0, %v684_v46 }
 0x2a3   :  { %v580_v3 = vpop.permute.xlu0 %579 }
 0x2a7   :  { %v590_v14 = vpop.permute.xlu0 %589 }
 0x369   :  { %v542_v48 = vpop.f32.mrb[4].mxu0 }
 0x36a   :  { %v543_v49 = vadd.f32 %v542_v48, %v447_v47  ;;  %v544_v50 = vpop.f32.mrb[5].mxu0 }
 0x36b   :  { %v545_v51 = vadd.f32 %v544_v50, %v447_v47 }
 0x36c   :  { %780 = vtanh.f32 %v543_v49  ;;  %v635_v49 = vsub.s32 %v632_v44, %v940_v30 }
 0x36d   :  { %v548_v53 = vpop.f32.mrb[6].mxu0  ;;  %782 = vtanh.f32 %v545_v51 }
 0x36e   :  { %v549_v54 = vadd.f32 %v548_v53, %v452_v52  ;;  %v550_v55 = vpop.f32.mrb[7].mxu0 }
 0x36f   :  { %v551_v56 = vadd.f32 %v550_v55, %v452_v52 }
 0x370   :  { %784 = vtanh.f32 %v549_v54 }
 0x371   :  { %786 = vtanh.f32 %v551_v56  ;;  %v554_v57 = vpop.f32.mrb[8].mxu0 }
 0x372   :  { %v555_v58 = vadd.f32 %v554_v57, %v457_v22  ;;  %v556_v59 = vpop.f32.mrb[9].mxu0 }
 0x373   :  { %v557_v60 = vadd.f32 %v556_v59, %v457_v22 }
 0x374   :  { %788 = vtanh.f32 %v555_v58 }
 0x375   :  { %790 = vtanh.f32 %v557_v60  ;;  %v560_v62 = vpop.f32.mrb[10].mxu0 }
 0x376   :  { %v561_v63 = vadd.f32 %v560_v62, %v462_v61  ;;  %v562_v0 = vpop.f32.mrb[11].mxu0  ;;  %v781_v2 = vpop.eup %780 }
 0x377   :  { %v563_v1 = vadd.f32 %v562_v0, %v462_v61  ;;  %v783_v4 = vpop.eup %782  ;;  %v597_v8 = vmul.f32 %v781_v2, %v580_v3 }
 0x378   :  { %792 = vtanh.f32 %v561_v63  ;;  %v598_v10 = vmul.f32 %v783_v4, %v580_v3 }
 0x379   :  { %794 = vtanh.f32 %v563_v1 }
 0x37a   :  { %v785_v5 = vpop.eup %784 }
 0x37b   :  { %v787_v7 = vpop.eup %786  ;;  %v599_v9 = vmul.f32 %v785_v5, %v585_v6 }
 0x37c   :  { %v600_v11 = vmul.f32 %v787_v7, %v585_v6 }
 0x37d   :  { %v605_v12 = vadd.f32 %v599_v9, %v597_v8 }
 0x37e   :  { %v789_v13 = vpop.eup %788  ;;  %v614_v15 = vadd.f32 %v600_v11, %v598_v10 }
 0x37f   :  { %v791_v16 = vpop.eup %790  ;;  %v601_v17 = vmul.f32 %v789_v13, %v590_v14 }
 0x380   :  { %v602_v18 = vmul.f32 %v791_v16, %v590_v14 }
 0x381   :  { %v606_v19 = vadd.f32 %v605_v12, %v601_v17 }
 0x382   :  { %v793_v20 = vpop.eup %792  ;;  %v615_v23 = vadd.f32 %v614_v15, %v602_v18 }
 0x383   :  { %v795_v24 = vpop.eup %794  ;;  %v603_v25 = vmul.f32 %v793_v20, %v595_v21 }
 0x384   :  { %v604_v26 = vmul.f32 %v795_v24, %v595_v21 }
 0x385   :  { %v607_v28 = vadd.f32 %v606_v19, %v603_v25 }
 0x386   :  { %v616_v29 = vadd.f32 %v615_v23, %v604_v26 }
 0x387   :  { %v608_v31 = vrot.slane %v607_v28, 4 }
 0x388   :  { %v617_v32 = vrot.slane %v616_v29, 4 }
 0x389   :  { %v609_v33 = vadd.f32 %v608_v31, %v607_v28 }
 0x38a   :  { %v618_v34 = vadd.f32 %v617_v32, %v616_v29 }
 0x38b   :  { %v610_v35 = vrot.slane %v609_v33, 2 }
 0x38c   :  { %v619_v36 = vrot.slane %v618_v34, 2 }
 0x38d   :  { %v611_v39 = vadd.f32 %v610_v35, %v609_v33 }
 0x38e   :  { %v620_v40 = vadd.f32 %v619_v36, %v618_v34 }
 0x38f   :  { %v612_v41 = vrot.slane %v611_v39, 1 }
 0x390   :  { %v621_v42 = vrot.slane %v620_v40, 1 }
 0x391   :  { %v613_v45 = vadd.f32 %v612_v41, %v611_v39 }
 0x392   :  { %v622_v46 = vadd.f32 %v621_v42, %v620_v40 }
 0x393   :  { %v625_v47 = vadd.f32 %v624_v43, %v613_v45 }
 0x394   :  { %v626_v48 = vadd.f32 %v624_v43, %v622_v46 }
 0x396   :  { %v629_v50 = vcombine.low %v625_v47, %v626_v48 }
 0x398   :  { %v636_v51 = vrot.slane %v629_v50, %v635_v49 }
 0x39a   :  { %v643_v52 = vrot.slane %v636_v51, %v635_v49 }
 0x39c   :  { %649 = vst.msk [vmem:[#allocation3] sm:$0x3] %vm647_vm1, %v643_v52 }
 0x39d   :  { %807 = shalt.err (!%p804_p4)
}
 0x39e   :  { %s808_s5 = scalar_lea.hbm %s1032_s7, 32 }
 0x39f   :  { %p809_p5 = scmp.ne.s32.totalorder %s1032_s7, %s808_s5  ;;  %p812_p6 = scmp.lt.u32.totalorder %s808_s5, %s1032_s7 }
 0x3a1   :  { %p814_p7 = pnand %p812_p6, %p809_p5 }
 0x3a3   :  { %817 = shalt.err (!%p814_p7)
}
 0x3a4   :  { %659 = dma.vmem_to_hbm [thread:$0]  %s657_s24, 32, %s1032_s7, [#allocation4]  }
 0x3a5   :  { %818 = dma.done.wait [#allocation4], 32  }
 0x3a6   :  { %819 = vsyncadd [#allocation4], 4294967264 }
 0x3a7   :  { %663 = vsyncpa [#allocation4], 1 }

</bundles_post_ra>
